<compile_context>
chip_gen: v6e
topology: v6e:2x2x1
jax: 0.10.0
libtpu: 0.0.40
codegen_flags: <defaults>
</compile_context>

<pallas_src>
import numpy as np
import jax
import jax.numpy as jnp
from jax.experimental import pallas as pl
from jax.experimental.pallas import tpu as pltpu

EPS = 1e-5


def _interp_matrix_np(l_in, l_out):
    """(l_out, l_in) matrix reproducing F.interpolate(mode='linear',
    align_corners=False). Host-side numpy constant."""
    scale = l_in / l_out
    i = np.arange(l_out, dtype=np.float64)
    src = np.maximum(scale * (i + 0.5) - 0.5, 0.0)
    i0 = np.clip(np.floor(src).astype(np.int64), 0, l_in - 1)
    i1 = np.minimum(i0 + 1, l_in - 1)
    lam = src - i0
    m = np.zeros((l_out, l_in), np.float64)
    rows = np.arange(l_out)
    m[rows, i0] += 1.0 - lam
    m[rows, i1] += lam
    return m.astype(np.float32)


def up_kernel(x2_ref, x1_ref, mbd_ref, w1_ref, g1_ref, be1_ref,
              w2_ref, g2_ref, be2_ref, o_ref):
    # Layout: activations are (C, N) with channels on sublanes and the
    # flattened (batch, length) axis N = B*L2 on lanes (lane-dense).
    B, Cout, L2 = o_ref.shape
    C2, N = x2_ref.shape
    inv_n = 1.0 / float(N)                      # BN normalizer over (batch, L)

    # Lane-position masks for the k=3 taps: zero-padding at each per-batch
    # sequence boundary, computed in-kernel (no mask input DMA).
    pos = jax.lax.broadcasted_iota(jnp.int32, (1, N), 1)
    has_left = (pos % L2) != 0                  # x[:, p-1] exists inside batch
    has_right = (pos % L2) != (L2 - 1)          # x[:, p+1] exists inside batch

    def shift_right(v):                         # out[:, p] = v[:, p-1]
        z = jnp.zeros((v.shape[0], 1), jnp.float32)
        return jnp.concatenate([z, v[:, :N - 1]], axis=1)

    def shift_left(v):                          # out[:, p] = v[:, p+1]
        z = jnp.zeros((v.shape[0], 1), jnp.float32)
        return jnp.concatenate([v[:, 1:], z], axis=1)

    def conv3(v, w_ref):
        # k=3, pad=1 conv as 3 accumulated MXU dots on lane-shifted operands.
        # Conv bias omitted: a per-channel constant cancels under training BN.
        vm1 = jnp.where(has_left, shift_right(v), 0.0)
        vp1 = jnp.where(has_right, shift_left(v), 0.0)
        acc = jnp.dot(w_ref[1], v, preferred_element_type=jnp.float32)
        acc = acc + jnp.dot(w_ref[0], vm1, preferred_element_type=jnp.float32)
        acc = acc + jnp.dot(w_ref[2], vp1, preferred_element_type=jnp.float32)
        return acc

    def bn_relu(h, g_ref, be_ref):
        # BatchNorm1d training-mode batch stats (biased variance), fused on
        # the conv result while it is still in registers, then ReLU.
        mean = jnp.sum(h, axis=1, keepdims=True) * inv_n
        d = h - mean
        var = jnp.sum(d * d, axis=1, keepdims=True) * inv_n
        scale = g_ref[...] * jax.lax.rsqrt(var + EPS)
        return jnp.maximum(d * scale + be_ref[...], 0.0)

    # Linear upsample of x1 to length L2 for ALL batches in one matmul:
    # (C1, B*L1) @ block-diag(M^T) -> (C1, B*L2)
    x1u = jnp.dot(x1_ref[...], mbd_ref[...], preferred_element_type=jnp.float32)

    # cat([x2, x1], dim=1): channel concat = sublane concat (x2 channels first).
    x = jnp.concatenate([x2_ref[...], x1u], axis=0)          # (Cin, N)

    h = bn_relu(conv3(x, w1_ref), g1_ref, be1_ref)            # (Cmid, N)
    y = bn_relu(conv3(h, w2_ref), g2_ref, be2_ref)            # (Cout, N)

    # Emit NCL directly: (Cout, B*L2) -> (B, Cout, L2); L stays on lanes.
    for b in range(B):
        o_ref[b] = y[:, b * L2:(b + 1) * L2]


def up_forward(x1_ncl, x2_ncl, params):
    """x1_ncl: (B, C1, L1), x2_ncl: (B, C2, L2) in PyTorch NCL layout.
    Returns (B, Cout, L2) in NCL layout."""
    B, C1, L1 = x1_ncl.shape
    Bb, C2, L2 = x2_ncl.shape
    assert B == Bb
    w1 = params["w1"]                    # (Cmid, Cin, 3)  PyTorch Conv1d layout
    w2 = params["w2"]                    # (Cout, Cmid, 3)
    Cmid, Cout = w1.shape[0], w2.shape[0]
    N = B * L2

    # --- layout plumbing only: channels -> sublanes, (batch, L) -> lanes ---
    x2_flat = jnp.transpose(x2_ncl, (1, 0, 2)).reshape(C2, N).astype(jnp.float32)
    x1_flat = jnp.transpose(x1_ncl, (1, 0, 2)).reshape(C1, B * L1).astype(jnp.float32)

    # Conv weights tap-major: (Co, Ci, 3) -> (3, Co, Ci); in-channel order
    # already matches cat([x2, x1], dim=1).
    w1t = jnp.transpose(w1, (2, 0, 1)).astype(jnp.float32)
    w2t = jnp.transpose(w2, (2, 0, 1)).astype(jnp.float32)

    g1 = params["g1"].reshape(Cmid, 1).astype(jnp.float32)
    be1 = params["be1"].reshape(Cmid, 1).astype(jnp.float32)
    g2 = params["g2"].reshape(Cout, 1).astype(jnp.float32)
    be2 = params["be2"].reshape(Cout, 1).astype(jnp.float32)
    # NOTE: params["b1"]/["b2"] (conv biases) are intentionally not passed:
    # they cancel exactly in training-mode BatchNorm (and are 0 at init).

    # Block-diagonal interpolation matrix (host constant): column b*L2+l picks
    # the align_corners=False linear blend of batch b's input samples.
    m = _interp_matrix_np(L1, L2)                      # (L2, L1)
    mbd = np.zeros((B * L1, N), np.float32)
    for b in range(B):
        mbd[b * L1:(b + 1) * L1, b * L2:(b + 1) * L2] = m.T
    mbd = jnp.asarray(mbd)

    vmem = pl.BlockSpec(memory_space=pltpu.MemorySpace.VMEM)
    return pl.pallas_call(
        up_kernel,
        out_shape=jax.ShapeDtypeStruct((B, Cout, L2), jnp.float32),
        in_specs=[vmem] * 9,
        out_specs=vmem,
    )(x2_flat, x1_flat, mbd, w1t, g1, be1, w2t, g2, be2)


def _ref_forward(x1, x2, params):
    """Pure-JAX reference (same math as the PyTorch module, training-mode BN)."""
    B, C1, L1 = x1.shape
    _, C2, L2 = x2.shape
    m = jnp.asarray(_interp_matrix_np(L1, L2))         # (L2, L1)
    x1u = jnp.einsum('lj,bcj->bcl', m, x1.astype(jnp.float32))
    x = jnp.concatenate([x2.astype(jnp.float32), x1u], axis=1)

    def block(x, w, b, g, be):
        L = x.shape[2]
        xp = jnp.pad(x, ((0, 0), (0, 0), (1, 1)))
        y = (jnp.einsum('oi,bil->bol', w[:, :, 0], xp[:, :, 0:L]) +
             jnp.einsum('oi,bil->bol', w[:, :, 1], xp[:, :, 1:L + 1]) +
             jnp.einsum('oi,bil->bol', w[:, :, 2], xp[:, :, 2:L + 2]) +
             b[None, :, None])
        mean = jnp.mean(y, axis=(0, 2), keepdims=True)
        var = jnp.mean((y - mean) ** 2, axis=(0, 2), keepdims=True)
        y = (y - mean) * jax.lax.rsqrt(var + EPS) * g[None, :, None] + be[None, :, None]
        return jnp.maximum(y, 0.0)

    h = block(x, params["w1"], params["b1"], params["g1"], params["be1"])
    return block(h, params["w2"], params["b2"], params["g2"], params["be2"])


if __name__ == "__main__":
    # Up(in_channels=8, out_channels=8): x1 has 4 ch @ L=8, x2 has 4 ch @ L=16.
    B, C1, L1 = 2, 4, 8
    C2, L2 = 4, 16
    in_channels = C1 + C2            # 8
    out_channels = 8
    mid_channels = in_channels // 2  # 4

    key = jax.random.PRNGKey(0)
    kx1, kx2, kw1, kw2 = jax.random.split(key, 4)
    x1 = jax.random.normal(kx1, (B, C1, L1), jnp.float32)   # NCL (PyTorch convention)
    x2 = jax.random.normal(kx2, (B, C2, L2), jnp.float32)

    # Deterministic params mirroring the module __init__:
    #   conv weights ~ N(0, 0.02), conv bias = 0, BN weight = 1, BN bias = 0.
    params = {
        "w1": 0.02 * jax.random.normal(kw1, (mid_channels, in_channels, 3), jnp.float32),
        "b1": jnp.zeros((mid_channels,), jnp.float32),
        "g1": jnp.ones((mid_channels,), jnp.float32),
        "be1": jnp.zeros((mid_channels,), jnp.float32),
        "w2": 0.02 * jax.random.normal(kw2, (out_channels, mid_channels, 3), jnp.float32),
        "b2": jnp.zeros((out_channels,), jnp.float32),
        "g2": jnp.ones((out_channels,), jnp.float32),
        "be2": jnp.zeros((out_channels,), jnp.float32),
    }

    y = up_forward(x1, x2, params)
    jax.block_until_ready(y)
    assert y.shape == (B, out_channels, L2), y.shape

    y_ref = _ref_forward(x1, x2, params)
    max_err = float(jnp.max(jnp.abs(y - y_ref)))
    assert np.isfinite(max_err) and max_err < 5e-2, f"max abs err vs reference = {max_err}"
    assert bool(jnp.all(y >= 0.0))   # final ReLU
    print("KERNEL_OK")
</pallas_src>

<mosaic_0001>
module attributes {stable_mosaic.version = 11 : i64} {
  func.func @up_kernel(%arg0: memref<4x32xf32, #tpu.memory_space<vmem>>, %arg1: memref<4x16xf32, #tpu.memory_space<vmem>>, %arg2: memref<16x32xf32, #tpu.memory_space<vmem>>, %arg3: memref<3x4x8xf32, #tpu.memory_space<vmem>>, %arg4: memref<4x1xf32, #tpu.memory_space<vmem>>, %arg5: memref<4x1xf32, #tpu.memory_space<vmem>>, %arg6: memref<3x8x4xf32, #tpu.memory_space<vmem>>, %arg7: memref<8x1xf32, #tpu.memory_space<vmem>>, %arg8: memref<8x1xf32, #tpu.memory_space<vmem>>, %arg9: memref<2x8x16xf32, #tpu.memory_space<vmem>>) attributes {dimension_semantics = [], scalar_prefetch = 0 : i64, scratch_operands = 0 : i64, tpu.core_type = #tpu.core_type<tc>} {
    %0 = tpu.iota {dimensions = array<i32: 1>} : vector<1x32xi32>
    %c16_i32 = arith.constant 16 : i32
    %c0_i32 = arith.constant 0 : i32
    %1 = arith.cmpi eq, %c16_i32, %c0_i32 : i32
    %c1_i32 = arith.constant 1 : i32
    %2 = arith.select %1, %c1_i32, %c16_i32 : i32
    %3 = vector.broadcast %2 : i32 to vector<1x32xi32>
    %4 = arith.remsi %0, %3 : vector<1x32xi32>
    %c0_i32_0 = arith.constant 0 : i32
    %5 = vector.broadcast %c0_i32_0 : i32 to vector<1x32xi32>
    %6 = arith.cmpi ne, %4, %5 : vector<1x32xi32>
    %c0_i32_1 = arith.constant 0 : i32
    %7 = vector.broadcast %c0_i32_1 : i32 to vector<1x32xi32>
    %8 = arith.cmpi slt, %4, %7 : vector<1x32xi32>
    %c0_i32_2 = arith.constant 0 : i32
    %9 = arith.cmpi slt, %2, %c0_i32_2 : i32
    %10 = vector.broadcast %9 : i1 to vector<1x32xi1>
    %11 = vector.broadcast %10 : vector<1x32xi1> to vector<1x32xi1>
    %12 = arith.xori %8, %11 : vector<1x32xi1>
    %13 = arith.andi %12, %6 : vector<1x32xi1>
    %14 = vector.broadcast %2 : i32 to vector<1x32xi32>
    %15 = arith.addi %4, %14 : vector<1x32xi32>
    %16 = arith.select %13, %15, %4 : vector<1x32xi1>, vector<1x32xi32>
    %c0_i32_3 = arith.constant 0 : i32
    %17 = vector.broadcast %c0_i32_3 : i32 to vector<1x32xi32>
    %18 = arith.cmpi ne, %16, %17 : vector<1x32xi32>
    %c16_i32_4 = arith.constant 16 : i32
    %c0_i32_5 = arith.constant 0 : i32
    %19 = arith.cmpi eq, %c16_i32_4, %c0_i32_5 : i32
    %c1_i32_6 = arith.constant 1 : i32
    %20 = arith.select %19, %c1_i32_6, %c16_i32_4 : i32
    %21 = vector.broadcast %20 : i32 to vector<1x32xi32>
    %22 = arith.remsi %0, %21 : vector<1x32xi32>
    %c0_i32_7 = arith.constant 0 : i32
    %23 = vector.broadcast %c0_i32_7 : i32 to vector<1x32xi32>
    %24 = arith.cmpi ne, %22, %23 : vector<1x32xi32>
    %c0_i32_8 = arith.constant 0 : i32
    %25 = vector.broadcast %c0_i32_8 : i32 to vector<1x32xi32>
    %26 = arith.cmpi slt, %22, %25 : vector<1x32xi32>
    %c0_i32_9 = arith.constant 0 : i32
    %27 = arith.cmpi slt, %20, %c0_i32_9 : i32
    %28 = vector.broadcast %27 : i1 to vector<1x32xi1>
    %29 = vector.broadcast %28 : vector<1x32xi1> to vector<1x32xi1>
    %30 = arith.xori %26, %29 : vector<1x32xi1>
    %31 = arith.andi %30, %24 : vector<1x32xi1>
    %32 = vector.broadcast %20 : i32 to vector<1x32xi32>
    %33 = arith.addi %22, %32 : vector<1x32xi32>
    %34 = arith.select %31, %33, %22 : vector<1x32xi1>, vector<1x32xi32>
    %c15_i32 = arith.constant 15 : i32
    %35 = vector.broadcast %c15_i32 : i32 to vector<1x32xi32>
    %36 = arith.cmpi ne, %34, %35 : vector<1x32xi32>
    %c0 = arith.constant 0 : index
    %c0_10 = arith.constant 0 : index
    %37 = vector.load %arg1[%c0, %c0_10] : memref<4x16xf32, #tpu.memory_space<vmem>>, vector<4x16xf32>
    %c0_11 = arith.constant 0 : index
    %c0_12 = arith.constant 0 : index
    %38 = vector.load %arg2[%c0_11, %c0_12] : memref<16x32xf32, #tpu.memory_space<vmem>>, vector<16x32xf32>
    %cst = arith.constant dense<0.000000e+00> : vector<4x32xf32>
    %39 = tpu.matmul %37, %38, %cst {dimension_numbers = #tpu.dot_dimension_numbers<[1], [0], [0], [1], [0, 0, 1, 1], [], []>} : vector<4x16xf32>, vector<16x32xf32>, vector<4x32xf32> -> vector<4x32xf32>
    %c0_13 = arith.constant 0 : index
    %c0_14 = arith.constant 0 : index
    %40 = vector.load %arg0[%c0_13, %c0_14] : memref<4x32xf32, #tpu.memory_space<vmem>>, vector<4x32xf32>
    %41 = tpu.concatenate %40, %39 in 0 : vector<4x32xf32>, vector<4x32xf32> -> vector<8x32xf32>
    %cst_15 = arith.constant 0.000000e+00 : f32
    %42 = vector.broadcast %cst_15 : f32 to vector<8x1xf32>
    %43 = vector.extract_strided_slice %41 {offsets = [0, 0], sizes = [8, 31], strides = [1, 1]} : vector<8x32xf32> to vector<8x31xf32>
    %44 = tpu.concatenate %42, %43 in 1 : vector<8x1xf32>, vector<8x31xf32> -> vector<8x32xf32>
    %cst_16 = arith.constant 0.000000e+00 : f32
    %45 = vector.shape_cast %18 : vector<1x32xi1> to vector<1x32xi1>
    %46 = vector.broadcast %45 : vector<1x32xi1> to vector<8x32xi1>
    %47 = vector.broadcast %cst_16 : f32 to vector<8x32xf32>
    %48 = arith.select %46, %44, %47 : vector<8x32xi1>, vector<8x32xf32>
    %cst_17 = arith.constant 0.000000e+00 : f32
    %49 = vector.broadcast %cst_17 : f32 to vector<8x1xf32>
    %50 = vector.extract_strided_slice %41 {offsets = [0, 1], sizes = [8, 31], strides = [1, 1]} : vector<8x32xf32> to vector<8x31xf32>
    %51 = tpu.concatenate %50, %49 in 1 : vector<8x31xf32>, vector<8x1xf32> -> vector<8x32xf32>
    %cst_18 = arith.constant 0.000000e+00 : f32
    %52 = vector.shape_cast %36 : vector<1x32xi1> to vector<1x32xi1>
    %53 = vector.broadcast %52 : vector<1x32xi1> to vector<8x32xi1>
    %54 = vector.broadcast %cst_18 : f32 to vector<8x32xf32>
    %55 = arith.select %53, %51, %54 : vector<8x32xi1>, vector<8x32xf32>
    %c1 = arith.constant 1 : index
    %c0_19 = arith.constant 0 : index
    %c0_20 = arith.constant 0 : index
    %56 = vector.load %arg3[%c1, %c0_19, %c0_20] : memref<3x4x8xf32, #tpu.memory_space<vmem>>, vector<1x4x8xf32>
    %57 = vector.shape_cast %56 : vector<1x4x8xf32> to vector<4x8xf32>
    %cst_21 = arith.constant dense<0.000000e+00> : vector<4x32xf32>
    %58 = tpu.matmul %57, %41, %cst_21 {dimension_numbers = #tpu.dot_dimension_numbers<[1], [0], [0], [1], [0, 0, 1, 1], [], []>} : vector<4x8xf32>, vector<8x32xf32>, vector<4x32xf32> -> vector<4x32xf32>
    %c0_22 = arith.constant 0 : index
    %c0_23 = arith.constant 0 : index
    %c0_24 = arith.constant 0 : index
    %59 = vector.load %arg3[%c0_22, %c0_23, %c0_24] : memref<3x4x8xf32, #tpu.memory_space<vmem>>, vector<1x4x8xf32>
    %60 = vector.shape_cast %59 : vector<1x4x8xf32> to vector<4x8xf32>
    %cst_25 = arith.constant dense<0.000000e+00> : vector<4x32xf32>
    %61 = tpu.matmul %60, %48, %cst_25 {dimension_numbers = #tpu.dot_dimension_numbers<[1], [0], [0], [1], [0, 0, 1, 1], [], []>} : vector<4x8xf32>, vector<8x32xf32>, vector<4x32xf32> -> vector<4x32xf32>
    %62 = arith.addf %58, %61 : vector<4x32xf32>
    %c2 = arith.constant 2 : index
    %c0_26 = arith.constant 0 : index
    %c0_27 = arith.constant 0 : index
    %63 = vector.load %arg3[%c2, %c0_26, %c0_27] : memref<3x4x8xf32, #tpu.memory_space<vmem>>, vector<1x4x8xf32>
    %64 = vector.shape_cast %63 : vector<1x4x8xf32> to vector<4x8xf32>
    %cst_28 = arith.constant dense<0.000000e+00> : vector<4x32xf32>
    %65 = tpu.matmul %64, %55, %cst_28 {dimension_numbers = #tpu.dot_dimension_numbers<[1], [0], [0], [1], [0, 0, 1, 1], [], []>} : vector<4x8xf32>, vector<8x32xf32>, vector<4x32xf32> -> vector<4x32xf32>
    %66 = arith.addf %62, %65 : vector<4x32xf32>
    %cst_29 = arith.constant dense<0.000000e+00> : vector<4xf32>
    %67 = vector.multi_reduction <add>, %66, %cst_29 [1] : vector<4x32xf32> to vector<4xf32>
    %68 = vector.shape_cast %67 : vector<4xf32> to vector<4x1xf32>
    %cst_30 = arith.constant 3.125000e-02 : f32
    %69 = vector.broadcast %cst_30 : f32 to vector<4x1xf32>
    %70 = arith.mulf %68, %69 : vector<4x1xf32>
    %71 = vector.broadcast %70 : vector<4x1xf32> to vector<4x32xf32>
    %72 = arith.subf %66, %71 : vector<4x32xf32>
    %73 = arith.mulf %72, %72 : vector<4x32xf32>
    %cst_31 = arith.constant dense<0.000000e+00> : vector<4xf32>
    %74 = vector.multi_reduction <add>, %73, %cst_31 [1] : vector<4x32xf32> to vector<4xf32>
    %75 = vector.shape_cast %74 : vector<4xf32> to vector<4x1xf32>
    %cst_32 = arith.constant 3.125000e-02 : f32
    %76 = vector.broadcast %cst_32 : f32 to vector<4x1xf32>
    %77 = arith.mulf %75, %76 : vector<4x1xf32>
    %c0_33 = arith.constant 0 : index
    %c0_34 = arith.constant 0 : index
    %78 = vector.load %arg4[%c0_33, %c0_34] : memref<4x1xf32, #tpu.memory_space<vmem>>, vector<4x1xf32>
    %cst_35 = arith.constant 9.99999974E-6 : f32
    %79 = vector.broadcast %cst_35 : f32 to vector<4x1xf32>
    %80 = arith.addf %77, %79 : vector<4x1xf32>
    %81 = math.rsqrt %80 : vector<4x1xf32>
    %82 = arith.mulf %78, %81 : vector<4x1xf32>
    %83 = vector.broadcast %82 : vector<4x1xf32> to vector<4x32xf32>
    %84 = arith.mulf %72, %83 : vector<4x32xf32>
    %c0_36 = arith.constant 0 : index
    %c0_37 = arith.constant 0 : index
    %85 = vector.load %arg5[%c0_36, %c0_37] : memref<4x1xf32, #tpu.memory_space<vmem>>, vector<4x1xf32>
    %86 = vector.broadcast %85 : vector<4x1xf32> to vector<4x32xf32>
    %87 = arith.addf %84, %86 : vector<4x32xf32>
    %cst_38 = arith.constant 0.000000e+00 : f32
    %88 = vector.broadcast %cst_38 : f32 to vector<4x32xf32>
    %89 = arith.maximumf %87, %88 : vector<4x32xf32>
    %cst_39 = arith.constant 0.000000e+00 : f32
    %90 = vector.broadcast %cst_39 : f32 to vector<4x1xf32>
    %91 = vector.extract_strided_slice %89 {offsets = [0, 0], sizes = [4, 31], strides = [1, 1]} : vector<4x32xf32> to vector<4x31xf32>
    %92 = tpu.concatenate %90, %91 in 1 : vector<4x1xf32>, vector<4x31xf32> -> vector<4x32xf32>
    %cst_40 = arith.constant 0.000000e+00 : f32
    %93 = vector.shape_cast %18 : vector<1x32xi1> to vector<1x32xi1>
    %94 = vector.broadcast %93 : vector<1x32xi1> to vector<4x32xi1>
    %95 = vector.broadcast %cst_40 : f32 to vector<4x32xf32>
    %96 = arith.select %94, %92, %95 : vector<4x32xi1>, vector<4x32xf32>
    %cst_41 = arith.constant 0.000000e+00 : f32
    %97 = vector.broadcast %cst_41 : f32 to vector<4x1xf32>
    %98 = vector.extract_strided_slice %89 {offsets = [0, 1], sizes = [4, 31], strides = [1, 1]} : vector<4x32xf32> to vector<4x31xf32>
    %99 = tpu.concatenate %98, %97 in 1 : vector<4x31xf32>, vector<4x1xf32> -> vector<4x32xf32>
    %cst_42 = arith.constant 0.000000e+00 : f32
    %100 = vector.shape_cast %36 : vector<1x32xi1> to vector<1x32xi1>
    %101 = vector.broadcast %100 : vector<1x32xi1> to vector<4x32xi1>
    %102 = vector.broadcast %cst_42 : f32 to vector<4x32xf32>
    %103 = arith.select %101, %99, %102 : vector<4x32xi1>, vector<4x32xf32>
    %c1_43 = arith.constant 1 : index
    %c0_44 = arith.constant 0 : index
    %c0_45 = arith.constant 0 : index
    %104 = vector.load %arg6[%c1_43, %c0_44, %c0_45] : memref<3x8x4xf32, #tpu.memory_space<vmem>>, vector<1x8x4xf32>
    %105 = vector.shape_cast %104 : vector<1x8x4xf32> to vector<8x4xf32>
    %cst_46 = arith.constant dense<0.000000e+00> : vector<8x32xf32>
    %106 = tpu.matmul %105, %89, %cst_46 {dimension_numbers = #tpu.dot_dimension_numbers<[1], [0], [0], [1], [0, 0, 1, 1], [], []>} : vector<8x4xf32>, vector<4x32xf32>, vector<8x32xf32> -> vector<8x32xf32>
    %c0_47 = arith.constant 0 : index
    %c0_48 = arith.constant 0 : index
    %c0_49 = arith.constant 0 : index
    %107 = vector.load %arg6[%c0_47, %c0_48, %c0_49] : memref<3x8x4xf32, #tpu.memory_space<vmem>>, vector<1x8x4xf32>
    %108 = vector.shape_cast %107 : vector<1x8x4xf32> to vector<8x4xf32>
    %cst_50 = arith.constant dense<0.000000e+00> : vector<8x32xf32>
    %109 = tpu.matmul %108, %96, %cst_50 {dimension_numbers = #tpu.dot_dimension_numbers<[1], [0], [0], [1], [0, 0, 1, 1], [], []>} : vector<8x4xf32>, vector<4x32xf32>, vector<8x32xf32> -> vector<8x32xf32>
    %110 = arith.addf %106, %109 : vector<8x32xf32>
    %c2_51 = arith.constant 2 : index
    %c0_52 = arith.constant 0 : index
    %c0_53 = arith.constant 0 : index
    %111 = vector.load %arg6[%c2_51, %c0_52, %c0_53] : memref<3x8x4xf32, #tpu.memory_space<vmem>>, vector<1x8x4xf32>
    %112 = vector.shape_cast %111 : vector<1x8x4xf32> to vector<8x4xf32>
    %cst_54 = arith.constant dense<0.000000e+00> : vector<8x32xf32>
    %113 = tpu.matmul %112, %103, %cst_54 {dimension_numbers = #tpu.dot_dimension_numbers<[1], [0], [0], [1], [0, 0, 1, 1], [], []>} : vector<8x4xf32>, vector<4x32xf32>, vector<8x32xf32> -> vector<8x32xf32>
    %114 = arith.addf %110, %113 : vector<8x32xf32>
    %cst_55 = arith.constant dense<0.000000e+00> : vector<8xf32>
    %115 = vector.multi_reduction <add>, %114, %cst_55 [1] : vector<8x32xf32> to vector<8xf32>
    %116 = vector.shape_cast %115 : vector<8xf32> to vector<8x1xf32>
    %cst_56 = arith.constant 3.125000e-02 : f32
    %117 = vector.broadcast %cst_56 : f32 to vector<8x1xf32>
    %118 = arith.mulf %116, %117 : vector<8x1xf32>
    %119 = vector.broadcast %118 : vector<8x1xf32> to vector<8x32xf32>
    %120 = arith.subf %114, %119 : vector<8x32xf32>
    %121 = arith.mulf %120, %120 : vector<8x32xf32>
    %cst_57 = arith.constant dense<0.000000e+00> : vector<8xf32>
    %122 = vector.multi_reduction <add>, %121, %cst_57 [1] : vector<8x32xf32> to vector<8xf32>
    %123 = vector.shape_cast %122 : vector<8xf32> to vector<8x1xf32>
    %cst_58 = arith.constant 3.125000e-02 : f32
    %124 = vector.broadcast %cst_58 : f32 to vector<8x1xf32>
    %125 = arith.mulf %123, %124 : vector<8x1xf32>
    %c0_59 = arith.constant 0 : index
    %c0_60 = arith.constant 0 : index
    %126 = vector.load %arg7[%c0_59, %c0_60] : memref<8x1xf32, #tpu.memory_space<vmem>>, vector<8x1xf32>
    %cst_61 = arith.constant 9.99999974E-6 : f32
    %127 = vector.broadcast %cst_61 : f32 to vector<8x1xf32>
    %128 = arith.addf %125, %127 : vector<8x1xf32>
    %129 = math.rsqrt %128 : vector<8x1xf32>
    %130 = arith.mulf %126, %129 : vector<8x1xf32>
    %131 = vector.broadcast %130 : vector<8x1xf32> to vector<8x32xf32>
    %132 = arith.mulf %120, %131 : vector<8x32xf32>
    %c0_62 = arith.constant 0 : index
    %c0_63 = arith.constant 0 : index
    %133 = vector.load %arg8[%c0_62, %c0_63] : memref<8x1xf32, #tpu.memory_space<vmem>>, vector<8x1xf32>
    %134 = vector.broadcast %133 : vector<8x1xf32> to vector<8x32xf32>
    %135 = arith.addf %132, %134 : vector<8x32xf32>
    %cst_64 = arith.constant 0.000000e+00 : f32
    %136 = vector.broadcast %cst_64 : f32 to vector<8x32xf32>
    %137 = arith.maximumf %135, %136 : vector<8x32xf32>
    %138 = vector.extract_strided_slice %137 {offsets = [0, 0], sizes = [8, 16], strides = [1, 1]} : vector<8x32xf32> to vector<8x16xf32>
    %c0_65 = arith.constant 0 : index
    %c0_66 = arith.constant 0 : index
    %c0_67 = arith.constant 0 : index
    %139 = vector.load %arg9[%c0_65, %c0_66, %c0_67] : memref<2x8x16xf32, #tpu.memory_space<vmem>>, vector<1x8x16xf32>
    %140 = vector.shape_cast %139 : vector<1x8x16xf32> to vector<8x16xf32>
    %141 = vector.shape_cast %138 : vector<8x16xf32> to vector<1x8x16xf32>
    tpu.vector_store %arg9[%c0_65, %c0_66, %c0_67], %141 {strides = array<i32>} : memref<2x8x16xf32, #tpu.memory_space<vmem>>, vector<1x8x16xf32>,
    %142 = vector.extract_strided_slice %137 {offsets = [0, 16], sizes = [8, 16], strides = [1, 1]} : vector<8x32xf32> to vector<8x16xf32>
    %c1_68 = arith.constant 1 : index
    %c0_69 = arith.constant 0 : index
    %c0_70 = arith.constant 0 : index
    %143 = vector.load %arg9[%c1_68, %c0_69, %c0_70] : memref<2x8x16xf32, #tpu.memory_space<vmem>>, vector<1x8x16xf32>
    %144 = vector.shape_cast %143 : vector<1x8x16xf32> to vector<8x16xf32>
    %145 = vector.shape_cast %142 : vector<8x16xf32> to vector<1x8x16xf32>
    tpu.vector_store %arg9[%c1_68, %c0_69, %c0_70], %145 {strides = array<i32>} : memref<2x8x16xf32, #tpu.memory_space<vmem>>, vector<1x8x16xf32>,
    return
  }
}

</mosaic_0001>

<bundles_post_ra>
// kernel: tpu_custom_call.1
= control target key start
LH: loop header
LB: loop body
LE: loop exit
PB: predicated region body
PF: predicated region fallthrough
CT: control target
= control target key end

     0   :  { %v806_v1 = vmov 0.0   ;;  %vm807_vm0 = vmmov 0   ;;  %s969_s0 = inlined_call_operand.vmem [shape: f32[4,32], index: 0, kind: input, shape index: {}]   ;;  %s970_s1 = inlined_call_operand.vmem [shape: f32[4,16], index: 1, kind: input, shape index: {}]   ;;  %s971_s2 = inlined_call_operand.vmem [shape: f32[16,32], index: 2, kind: input, shape index: {}]   ;;  %s972_s3 = inlined_call_operand.vmem [shape: f32[3,4,8], index: 3, kind: input, shape index: {}]   ;;  %s973_s4 = inlined_call_operand.vmem [shape: f32[4,1], index: 4, kind: input, shape index: {}]   ;;  %s974_s5 = inlined_call_operand.vmem [shape: f32[4,1], index: 5, kind: input, shape index: {}]   ;;  %s975_s6 = inlined_call_operand.vmem [shape: f32[3,8,4], index: 6, kind: input, shape index: {}]   ;;  %s976_s7 = inlined_call_operand.vmem [shape: f32[8,1], index: 7, kind: input, shape index: {}]   ;;  %s977_s8 = inlined_call_operand.vmem [shape: f32[8,1], index: 8, kind: input, shape index: {}]   ;;  %s978_s9 = inlined_call_operand.hbm [shape: f32[2,8,16], index: 9, kind: output, shape index: {}]  }
   0x1   :  { %v51_v0 = vld [vmem:[%s971_s2 + $0x8] sm:$0xff]  ;;  %732 = vmatprep.subr.mxu0 %v806_v1  ;;  %v50_v2 = vld [vmem:[%s971_s2] sm:$0xff]  ;;  %736 = vmatprep.mubr.msk.f32.mxu0 %vm807_vm0, %v806_v1 }
   0x2   :  { %14 = vsyncpa [#allocation3], 0  ;;  %733 = vmatpush3.msra.mxu0 %v51_v0  ;;  %v49_v3 = vld [vmem:[%s970_s1] sm:$0xf]  ;;  %vm52_vm1 = vcmask 130048   ;;  %739 = vmatprep.subr.mxu1 %v806_v1  ;;  %vm130_vm2 = vcmask 1043456   ;;  %v33_v9 = vlaneseq }
   0x3   :  { %734 = vmatprep.subr.mxu0 %v806_v1  ;;  %741 = vmatprep.mubr.msk.f32.mxu1 %vm807_vm0, %v806_v1  ;;  %v126_v5 = vld [vmem:[%s969_s0] sm:$0xf]  ;;  %s808_s1 = smov 1   ;;  %s809_s16 = smov 127   ;;  %vm136_vm3 = vcmask 7168   ;;  %vm152_vm5 = vcmask 64512  }
   0x4   :  { %735 = vmatpush3.msra.mxu0 %v50_v2  ;;  %v34_v10 = vand.u32 127, %v33_v9  ;;  %v151_v14 = vld [vmem:[%s972_s3] sm:$0xf]  ;;  %vm144_vm6 = vcmask 252928   ;;  %v702_v18 = vld [vmem:[%s972_s3 + $0x4] sm:$0xf] }
   0x5   :  { %737 = vmatmul.mubr.msk.f32.vlgmr.msra.gmra.mxu0 %vm52_vm1, %v49_v3  ;;  %749 = vmatprep.subr.mxu0 %v806_v1  ;;  %v706_v19 = vld [vmem:[%s972_s3 + $0x8] sm:$0xf]  ;;  %vm375_vm8 = vcmask 257024   ;;  %v810_v35 = vmov 0   ;;  %v396_v36 = vld [vmem:[%s974_s5] sm:$0xf] }
   0x6   :  { %751 = vmatprep.mubr.msk.f32.mxu0 %vm807_vm0, %v806_v1  ;;  %v39_v11 = vand.u32 15, %v34_v10  ;;  %778 = vset.pattern.permute.xlu0 %v810_v35  ;;  %v386_v40 = vld [vmem:[%s973_s4] sm:$0xf]  ;;  %vm418_vm9 = vcmask 31744   ;;  %v709_v48 = vld [vmem:[%s975_s6 + $0x8] sm:$0xff]  ;;  %v714_v55 = vld [vmem:[%s975_s6 + $0x10] sm:$0xff] }
   0x7   :  { %779 = vset.pattern.permute.xlu1 %v810_v35  ;;  %v417_v51 = vld [vmem:[%s975_s6] sm:$0xff]  ;;  %vm649_vm10 = vcmask 261120   ;;  %s812_s11 = smov [#allocation2]  }
   0x8   :  { %vm891_vm4 = vcmp.ne.s32.totalorder %v39_v11, 0  ;;  %vm903_vm7 = vcmp.ne.s32.totalorder %v39_v11, 15  ;;  %v660_v11 = vld [vmem:[%s976_s7] sm:$0xff]  ;;  %s690_s12 = sshll.u32 %s812_s11, 4  ;;  %s691_s12 = int_to_ptr.vmem [resolvable:$true] %s690_s12 }
   0x9   :  { %s784_s13 = scalar_lea.vmem %s691_s12, 256  ;;  %p789_p1 = scmp.lt.s32.totalorder %s691_s12, %s691_s12 }
   0xa   :  { %p785_p0 = scmp.ne.s32.totalorder %s691_s12, %s784_s13  ;;  %p790_p2 = scmp.lt.s32.totalorder %s784_s13, %s784_s13 }
   0xc   :  { %p791_p3 = por %p790_p2, %p789_p1 }
   0xe   :  { %p792_p4 = pnand %p791_p3, %p785_p0 }
  0xc5   :  { %v122_v4 = vpop.f32.mrf.mxu0 }
  0xc6   :  { %v128_v6 = vrot.slane %v122_v4, 4 }
  0xc7   :  { %v738_v7 = vpop.f32.mrf.mxu0 }
  0xc8   :  { %v131_v8 = vsel %vm130_vm2, %v126_v5, %v128_v6  ;;  %v670_v7 = vld [vmem:[%s977_s8] sm:$0xff]  ;;  %s811_s8 = smov 112  }
  0xc9   :  { %133 = vrot.lane.b32.xlu0 %v131_v8, %s808_s1 }
  0xcd   :  { %141 = vrot.lane.b32.xlu0 %v131_v8, %s809_s16 }
 0x13b   :  { %v134_v13 = vpop.permute.xlu0 %133 }
 0x13c   :  { %v137_v15 = vsel %vm136_vm3, 0.0, %v134_v13 }
 0x13d   :  { %740 = vmatpush3.msk.msra.mxu1 %vm891_vm4, %v137_v15 }
 0x13e   :  { %742 = vmatmul.mubr.msk.f32.vlgmr.msra.gmra.mxu1 %vm152_vm5, %v151_v14  ;;  %744 = vmatprep.subr.mxu1 %v806_v1 }
 0x13f   :  { %v142_v17 = vpop.permute.xlu0 %141  ;;  %745 = vmatpush3.msra.mxu1 %v131_v8  ;;  %746 = vmatprep.mubr.msk.f32.mxu1 %vm807_vm0, %v806_v1 }
 0x140   :  { %v145_v20 = vsel %vm144_vm6, %v142_v17, 0.0  ;;  %754 = vmatprep.subr.mxu1 %v806_v1 }
 0x141   :  { %750 = vmatpush3.msk.msra.mxu0 %vm903_vm7, %v145_v20 }
 0x142   :  { %747 = vmatmul.mubr.msk.f32.vlgmr.msra.gmra.mxu1 %vm152_vm5, %v702_v18  ;;  %752 = vmatmul.mubr.msk.f32.vlgmr.msra.gmra.mxu0 %vm152_vm5, %v706_v19 }
 0x143   :  { %759 = vmatprep.subr.mxu0 %v806_v1  ;;  %756 = vmatprep.mubr.msk.f32.mxu1 %vm807_vm0, %v806_v1 }
 0x144   :  { %761 = vmatprep.mubr.msk.f32.mxu0 %vm807_vm0, %v806_v1 }
 0x1fe   :  { %v222_v21 = vpop.f32.mrf.mxu1 }
 0x200   :  { %v743_v22 = vpop.f32.mrf.mxu1 }
 0x202   :  { %v295_v23 = vpop.f32.mrf.mxu1  ;;  %v370_v24 = vpop.f32.mrf.mxu0 }
 0x203   :  { %v296_v25 = vadd.f32 %v295_v23, %v222_v21 }
 0x204   :  { %v748_v26 = vpop.f32.mrf.mxu1  ;;  %v753_v27 = vpop.f32.mrf.mxu0 }
 0x205   :  { %v374_v28 = vadd.f32 %v370_v24, %v296_v25 }
 0x207   :  { %v376_v29 = vsel %vm375_vm8, %v374_v28, 0.0 }
 0x208   :  { %377 = vadd.xlane.f32.xlu1 %v376_v29 }
 0x291   :  { %v378_v30 = vpop.xlane.xlu1 %377 }
 0x292   :  { %v379_v31 = vmul.f32 0.03125, %v378_v30 }
 0x294   :  { %v380_v32 = vsub.f32 %v374_v28, %v379_v31 }
 0x296   :  { %v381_v33 = vmul.f32 %v380_v32, %v380_v32 }
 0x298   :  { %v382_v34 = vsel %vm375_vm8, %v381_v33, 0.0 }
 0x299   :  { %383 = vadd.xlane.f32.xlu1 %v382_v34 }
 0x2aa   :  { %399 = vperm.xlu1 %779, %v396_v36  }
 0x322   :  { %v384_v37 = vpop.xlane.xlu1 %383 }
 0x323   :  { %v385_v38 = vmul.f32 0.03125, %v384_v37 }
 0x325   :  { %v387_v39 = vadd.f32 1e-05, %v385_v38 }
 0x326   :  { %v400_v44 = vpop.permute.xlu1 %399 }
 0x327   :  { %780 = vrsqrt.f32 %v387_v39 }
 0x334   :  { %v781_v41 = vpop.eup %780 }
 0x335   :  { %v389_v42 = vmul.f32 %v781_v41, %v386_v40 }
 0x337   :  { %392 = vperm.xlu0 %778, %v389_v42  }
 0x3b2   :  { %v393_v43 = vpop.permute.xlu0 %392 }
 0x3b3   :  { %v395_v45 = vmul.f32 %v393_v43, %v380_v32 }
 0x3b5   :  { %v402_v46 = vadd.f32 %v400_v44, %v395_v45 }
 0x3b7   :  { %v403_v47 = vmax.f32 %v402_v46, 0.0 }
 0x3b9   :  { %405 = vrot.lane.b32.xlu0 %v403_v47, %s808_s1  ;;  %760 = vmatpush3.msk.msra.mxu0 %vm130_vm2, %v403_v47 }
 0x3ba   :  { %762 = vmatmul.mubr.msk.f32.vlgmr.msra.gmra.mxu0 %vm418_vm9, %v709_v48 }
 0x3bd   :  { %410 = vrot.lane.b32.xlu0 %v403_v47, %s809_s16 }
 0x42b   :  { %v406_v49 = vpop.permute.xlu0 %405 }
 0x42c   :  { %v408_v50 = vsel %vm136_vm3, 0.0, %v406_v49 }
 0x42d   :  { %v409_v52 = vsel %vm891_vm4, %v408_v50, 0.0 }
 0x42e   :  { %755 = vmatpush3.msk.msra.mxu1 %vm130_vm2, %v409_v52 }
 0x42f   :  { %757 = vmatmul.mubr.msk.f32.vlgmr.msra.gmra.mxu1 %vm418_vm9, %v417_v51  ;;  %v411_v53 = vpop.permute.xlu0 %410  ;;  %764 = vmatprep.subr.mxu1 %v806_v1 }
 0x430   :  { %v413_v54 = vsel %vm144_vm6, %v411_v53, 0.0  ;;  %766 = vmatprep.mubr.msk.f32.mxu1 %vm807_vm0, %v806_v1 }
 0x431   :  { %v414_v56 = vsel %vm903_vm7, %v413_v54, 0.0 }
 0x432   :  { %765 = vmatpush3.msk.msra.mxu1 %vm130_vm2, %v414_v56 }
 0x433   :  { %767 = vmatmul.mubr.msk.f32.vlgmr.msra.gmra.mxu1 %vm418_vm9, %v714_v55 }
 0x47a   :  { %v566_v57 = vpop.f32.mrf.mxu0 }
 0x47c   :  { %v763_v58 = vpop.f32.mrf.mxu0 }
 0x4ef   :  { %v491_v59 = vpop.f32.mrf.mxu1 }
 0x4f0   :  { %v567_v61 = vadd.f32 %v566_v57, %v491_v59 }
 0x4f1   :  { %v758_v60 = vpop.f32.mrf.mxu1 }
 0x4f3   :  { %v644_v62 = vpop.f32.mrf.mxu1 }
 0x4f4   :  { %v648_v63 = vadd.f32 %v644_v62, %v567_v61 }
 0x4f5   :  { %v768_v0 = vpop.f32.mrf.mxu1 }
 0x4f6   :  { %v650_v1 = vsel %vm649_vm10, %v648_v63, 0.0 }
 0x4f7   :  { %651 = vadd.xlane.f32.xlu0 %v650_v1 }
 0x580   :  { %v652_v2 = vpop.xlane.xlu0 %651 }
 0x581   :  { %v653_v3 = vmul.f32 0.03125, %v652_v2 }
 0x583   :  { %v654_v4 = vsub.f32 %v648_v63, %v653_v3 }
 0x585   :  { %v655_v5 = vmul.f32 %v654_v4, %v654_v4 }
 0x587   :  { %v656_v6 = vsel %vm649_vm10, %v655_v5, 0.0 }
 0x588   :  { %657 = vadd.xlane.f32.xlu1 %v656_v6 }
 0x599   :  { %673 = vperm.xlu1 %779, %v670_v7  }
 0x611   :  { %v658_v8 = vpop.xlane.xlu1 %657 }
 0x612   :  { %v659_v9 = vmul.f32 0.03125, %v658_v8 }
 0x614   :  { %v661_v10 = vadd.f32 1e-05, %v659_v9 }
 0x615   :  { %v674_v16 = vpop.permute.xlu1 %673 }
 0x616   :  { %782 = vrsqrt.f32 %v661_v10 }
 0x623   :  { %v783_v12 = vpop.eup %782 }
 0x624   :  { %v663_v13 = vmul.f32 %v783_v12, %v660_v11 }
 0x626   :  { %666 = vperm.xlu0 %778, %v663_v13  }
 0x6a1   :  { %v667_v14 = vpop.permute.xlu0 %666 }
 0x6a2   :  { %v669_v15 = vmul.f32 %v667_v14, %v654_v4 }
 0x6a4   :  { %v676_v17 = vadd.f32 %v674_v16, %v669_v15 }
 0x6a6   :  { %v677_v18 = vmax.f32 %v676_v17, 0.0 }
 0x6a8   :  { %678 = vst.msk [vmem:[#allocation2] sm:$0xff] %vm52_vm1, %v677_v18  ;;  %680 = vrot.lane.b32.xlu0 %v677_v18, %s811_s8 }
 0x71a   :  { %v681_v19 = vpop.permute.xlu0 %680 }
 0x71b   :  { %684 = vst.msk [vmem:[#allocation2 + $0x8] sm:$0xff] %vm52_vm1, %v681_v19 }
 0x71c   :  { %795 = shalt.err (!%p792_p4)
}
 0x71d   :  { %s813_s7 = smov 128   ;;  %s814_s14 = smov 8  }
 0x71e   :  { %696 = dma.vmem_to_hbm [thread:$0]  %s691_s12, 256, %s978_s9, [#allocation3], %s813_s7, %s813_s7, %s814_s14  }
 0x71f   :  { %804 = dma.done.wait [#allocation3], 256  }
 0x720   :  { %805 = vsyncadd [#allocation3], 4294967040 }
 0x721   :  { %700 = vsyncpa [#allocation3], 1 }

</bundles_post_ra>
